<compile_context>
chip_gen: v6e
topology: v6e:2x2x1
jax: 0.10.0
libtpu: 0.0.40
codegen_flags: <defaults>
</compile_context>

<pallas_src>
import math

import jax
import jax.numpy as jnp
from jax.experimental import pallas as pl
from jax.experimental.pallas import tpu as pltpu

_HALF_LOG_2PI = 0.5 * math.log(2.0 * math.pi)


def _round_up(v, m):
    return ((v + m - 1) // m) * m


def _mosaic_params(**kw):
    cls = getattr(pltpu, "CompilerParams", None)
    if cls is None:  # very old jax fallback name
        cls = getattr(pltpu, "TPUCompilerParams")
    return cls(**kw)


# ---------------------------------------------------------------------------
# Kernel 1: reparameterized sample + log_prior / log_variational_posterior.
# Gridded over row tiles of the weight; scalar sums accumulate in SMEM outputs.
# ---------------------------------------------------------------------------
def _make_reparam_kernel(prior_std, n_params):
    log_prior_std = math.log(prior_std)
    inv_prior_var = 1.0 / (prior_std * prior_std)
    prior_const = float(n_params) * (log_prior_std + _HALF_LOG_2PI)
    q_const = float(n_params) * _HALF_LOG_2PI

    def kernel(w_mu_ref, w_ls_ref, eps_w_ref, b_mu_ref, b_ls_ref, eps_b_ref,
               w_ref, b_ref, logp_ref, logq_ref):
        i = pl.program_id(0)

        @pl.when(i == 0)
        def _init():
            logp_ref[0, 0] = -prior_const
            logq_ref[0, 0] = -q_const

        w_mu = w_mu_ref[...]
        w_ls = w_ls_ref[...]
        eps_w = eps_w_ref[...]
        w = w_mu + jnp.exp(w_ls) * eps_w
        w_ref[...] = w

        # log p(W) partial:  -0.5/s^2 * sum(W^2)   (constants folded into init)
        logp_ref[0, 0] += (-0.5 * inv_prior_var) * jnp.sum(w * w)
        # log q(W) partial:  (W - mu)/sigma == eps
        logq_ref[0, 0] += -0.5 * jnp.sum(eps_w * eps_w) - jnp.sum(w_ls)

        @pl.when(i == pl.num_programs(0) - 1)
        def _bias():
            b_mu = b_mu_ref[...]
            b_ls = b_ls_ref[...]
            eps_b = eps_b_ref[...]
            b = b_mu + jnp.exp(b_ls) * eps_b
            b_ref[...] = b
            logp_ref[0, 0] += (-0.5 * inv_prior_var) * jnp.sum(b * b)
            logq_ref[0, 0] += -0.5 * jnp.sum(eps_b * eps_b) - jnp.sum(b_ls)

    return kernel


# ---------------------------------------------------------------------------
# Kernel 2: y = x @ W^T + b.  W stays in its natural [out_f, in_f] layout; the
# MXU contracts the last dim of both operands (trans-B form), so no wrapper
# transpose and no lane-padding passes over HBM.
# ---------------------------------------------------------------------------
def _linear_kernel(x_ref, w_ref, b_ref, o_ref):
    acc = jax.lax.dot_general(
        x_ref[...], w_ref[...],
        dimension_numbers=(((1,), (1,)), ((), ())),
        preferred_element_type=jnp.float32,
    )
    o_ref[...] = (acc + b_ref[...]).astype(o_ref.dtype)


# ---------------------------------------------------------------------------
# Tile-size heuristics (VMEM-budgeted, generation-safe)
# ---------------------------------------------------------------------------
def _choose_weight_row_tile(out_f, in_f):
    # 4 weight-shaped f32 streams (mu, log_sigma, eps, sample), double-buffered.
    budget = 24 * 1024 * 1024
    cap = max(8, (budget // (8 * 4 * max(in_f, 1))) // 8 * 8)
    if out_f % 8 != 0 or out_f <= 8:
        return out_f                      # single full-extent block (small layer)
    tile = min(out_f, cap)
    while out_f % tile != 0:              # exact divisor -> no row masking needed
        tile -= 8
    return max(tile, 8)


def _choose_batch_tile(batch, in_f, out_f):
    b8 = _round_up(max(batch, 1), 8)
    # Per grid step (f32): double-buffered x tile + double-buffered y tile,
    # with the (double-buffered) weight resident on top.
    budget = 32 * 1024 * 1024 - 2 * 4 * out_f * in_f
    row_bytes = 2 * 4 * (in_f + out_f)
    cap = max(8, min(2048, (max(budget, 8 * row_bytes) // row_bytes) // 8 * 8))
    tile_b = min(cap, b8)
    # v7x: two TensorCores share the "parallel" axis -> give big batches >=2 steps.
    if b8 >= 512 and b8 // tile_b < 2:
        tile_b = _round_up(-(-b8 // 2), 8)
    return tile_b


# ---------------------------------------------------------------------------
# Wrapper
# ---------------------------------------------------------------------------
def bayesian_linear_forward(x, weight_mu, weight_log_sigma, bias_mu, bias_log_sigma,
                            key, prior_std=1.0):
    """Returns (y, sampled_weight, sampled_bias, log_prior, log_variational_posterior)."""
    x = jnp.asarray(x, jnp.float32)
    out_f, in_f = weight_mu.shape
    batch, d = x.shape
    assert d == in_f

    # eps ~ N(0, 1) via the portable JAX RNG (runs in both interpreter and Mosaic).
    kw, kb = jax.random.split(key)
    eps_w = jax.random.normal(kw, (out_f, in_f), dtype=jnp.float32)
    eps_b = jax.random.normal(kb, (1, out_f), dtype=jnp.float32)

    w_mu = jnp.asarray(weight_mu, jnp.float32)
    w_ls = jnp.asarray(weight_log_sigma, jnp.float32)
    b_mu = jnp.asarray(bias_mu, jnp.float32).reshape(1, out_f)
    b_ls = jnp.asarray(bias_log_sigma, jnp.float32).reshape(1, out_f)

    n_params = out_f * in_f + out_f

    # --- Kernel 1: reparameterize + log-probs (row-tiled, SMEM accumulation) --
    tile_r = _choose_weight_row_tile(out_f, in_f)
    grid_r = out_f // tile_r if out_f % tile_r == 0 else 1
    if grid_r == 1:
        tile_r = out_f

    w_tile_spec = pl.BlockSpec((tile_r, in_f), lambda i: (i, 0))
    bias_spec = pl.BlockSpec((1, out_f), lambda i: (0, 0))
    smem_spec = pl.BlockSpec((1, 1), lambda i: (0, 0), memory_space=pltpu.SMEM)

    w_sample, b_sample, log_prior, log_q = pl.pallas_call(
        _make_reparam_kernel(prior_std, n_params),
        out_shape=(
            jax.ShapeDtypeStruct((out_f, in_f), jnp.float32),
            jax.ShapeDtypeStruct((1, out_f), jnp.float32),
            jax.ShapeDtypeStruct((1, 1), jnp.float32),
            jax.ShapeDtypeStruct((1, 1), jnp.float32),
        ),
        grid=(grid_r,),
        in_specs=[w_tile_spec, w_tile_spec, w_tile_spec,
                  bias_spec, bias_spec, bias_spec],
        out_specs=(w_tile_spec, bias_spec, smem_spec, smem_spec),
        compiler_params=_mosaic_params(
            dimension_semantics=("arbitrary",),
            vmem_limit_bytes=64 * 1024 * 1024),
    )(w_mu, w_ls, eps_w, b_mu, b_ls, eps_b)

    # --- Kernel 2: linear layer, batch-parallel grid ---------------------------
    tile_b = _choose_batch_tile(batch, in_f, out_f)
    b_pad = _round_up(batch, tile_b)
    x_p = x if b_pad == batch else jnp.pad(x, ((0, b_pad - batch), (0, 0)))

    y = pl.pallas_call(
        _linear_kernel,
        out_shape=jax.ShapeDtypeStruct((b_pad, out_f), jnp.float32),
        grid=(b_pad // tile_b,),
        in_specs=[
            pl.BlockSpec((tile_b, in_f), lambda i: (i, 0)),
            pl.BlockSpec((out_f, in_f), lambda i: (0, 0)),
            pl.BlockSpec((1, out_f), lambda i: (0, 0)),
        ],
        out_specs=pl.BlockSpec((tile_b, out_f), lambda i: (i, 0)),
        compiler_params=_mosaic_params(
            dimension_semantics=("parallel",),
            vmem_limit_bytes=64 * 1024 * 1024),
    )(x_p, w_sample, b_sample)
    if b_pad != batch:
        y = y[:batch]

    return y, w_sample, b_sample[0], log_prior[0, 0], log_q[0, 0]


if __name__ == "__main__":
    root = jax.random.PRNGKey(0)
    kx, kw, kb, knoise = jax.random.split(root, 4)

    B, IN_F, OUT_F = 8, 32, 16
    PRIOR_STD = 1.0

    x = jax.random.normal(kx, (B, IN_F), dtype=jnp.float32)
    # Module init is (zeros, -3.0); use small random mu so the check is non-trivial.
    weight_mu = 0.1 * jax.random.normal(kw, (OUT_F, IN_F), dtype=jnp.float32)
    weight_log_sigma = jnp.full((OUT_F, IN_F), -3.0, dtype=jnp.float32)
    bias_mu = 0.1 * jax.random.normal(kb, (OUT_F,), dtype=jnp.float32)
    bias_log_sigma = jnp.full((OUT_F,), -3.0, dtype=jnp.float32)

    out, w_s, b_s, log_prior, log_q = bayesian_linear_forward(
        x, weight_mu, weight_log_sigma, bias_mu, bias_log_sigma,
        key=knoise, prior_std=PRIOR_STD)
    out = jax.block_until_ready(out)

    # Consistency checks against a plain-JAX reference built from the returned
    # sample (verifies the reparameterization / log-prob / linear math).
    def normal_logpdf(v, mu, sigma):
        return -0.5 * ((v - mu) / sigma) ** 2 - jnp.log(sigma) - 0.5 * jnp.log(2.0 * jnp.pi)

    ref_out = x @ w_s.T + b_s
    ref_log_prior = (normal_logpdf(w_s, 0.0, PRIOR_STD).sum()
                     + normal_logpdf(b_s, 0.0, PRIOR_STD).sum())
    ref_log_q = (normal_logpdf(w_s, weight_mu, jnp.exp(weight_log_sigma)).sum()
                 + normal_logpdf(b_s, bias_mu, jnp.exp(bias_log_sigma)).sum())

    assert out.shape == (B, OUT_F)
    assert bool(jnp.all(jnp.isfinite(out)))
    assert jnp.allclose(out, ref_out, atol=1e-4, rtol=1e-4)
    assert jnp.allclose(log_prior, ref_log_prior, atol=1e-3, rtol=1e-4)
    assert jnp.allclose(log_q, ref_log_q, atol=1e-3, rtol=1e-4)

    print("KERNEL_OK")
</pallas_src>

<mosaic_0001>
module attributes {stable_mosaic.version = 11 : i64} {
  func.func @kernel(%arg0: i32, %arg1: memref<16x32xf32, #tpu.memory_space<vmem>>, %arg2: memref<16x32xf32, #tpu.memory_space<vmem>>, %arg3: memref<16x32xf32, #tpu.memory_space<vmem>>, %arg4: memref<1x16xf32, #tpu.memory_space<vmem>>, %arg5: memref<1x16xf32, #tpu.memory_space<vmem>>, %arg6: memref<1x16xf32, #tpu.memory_space<vmem>>, %arg7: memref<16x32xf32, #tpu.memory_space<vmem>>, %arg8: memref<1x16xf32, #tpu.memory_space<vmem>>, %arg9: memref<1x1xf32, #tpu.memory_space<smem>>, %arg10: memref<1x1xf32, #tpu.memory_space<smem>>) attributes {dimension_semantics = [#tpu.dimension_semantics<arbitrary>], iteration_bounds = array<i64: 1>, scalar_prefetch = 0 : i64, scratch_operands = 0 : i64, tpu.core_type = #tpu.core_type<tc>, window_params = [{transform_indices = @transform_0, window_bounds = array<i64: 16, 32>}, {transform_indices = @transform_1, window_bounds = array<i64: 16, 32>}, {transform_indices = @transform_2, window_bounds = array<i64: 16, 32>}, {pipeline_mode = #tpu.pipeline_mode<synchronous>, transform_indices = @transform_3, window_bounds = array<i64: 1, 16>}, {pipeline_mode = #tpu.pipeline_mode<synchronous>, transform_indices = @transform_4, window_bounds = array<i64: 1, 16>}, {pipeline_mode = #tpu.pipeline_mode<synchronous>, transform_indices = @transform_5, window_bounds = array<i64: 1, 16>}, {transform_indices = @transform_6, window_bounds = array<i64: 16, 32>}, {pipeline_mode = #tpu.pipeline_mode<synchronous>, transform_indices = @transform_7, window_bounds = array<i64: 1, 16>}, {transform_indices = @transform_8, window_bounds = array<i64: 1, 1>}, {transform_indices = @transform_9, window_bounds = array<i64: 1, 1>}]} {
    %c0_i32 = arith.constant 0 : i32
    %0 = arith.cmpi eq, %arg0, %c0_i32 : i32
    %1 = arith.extui %0 : i1 to i32
    %c0_i32_0 = arith.constant 0 : i32
    %2 = arith.cmpi ne, %1, %c0_i32_0 : i32
    scf.if %2 {
      %cst_22 = arith.constant -485.199554 : f32
      %c0_23 = arith.constant 0 : index
      %c0_24 = arith.constant 0 : index
      %36 = memref.load %arg9[%c0_23, %c0_24] : memref<1x1xf32, #tpu.memory_space<smem>>
      memref.store %cst_22, %arg9[%c0_23, %c0_24] : memref<1x1xf32, #tpu.memory_space<smem>>
      %cst_25 = arith.constant -485.199554 : f32
      %c0_26 = arith.constant 0 : index
      %c0_27 = arith.constant 0 : index
      %37 = memref.load %arg10[%c0_26, %c0_27] : memref<1x1xf32, #tpu.memory_space<smem>>
      memref.store %cst_25, %arg10[%c0_26, %c0_27] : memref<1x1xf32, #tpu.memory_space<smem>>
    } else {
    }
    %c0 = arith.constant 0 : index
    %c0_1 = arith.constant 0 : index
    %3 = vector.load %arg1[%c0, %c0_1] : memref<16x32xf32, #tpu.memory_space<vmem>>, vector<16x32xf32>
    %c0_2 = arith.constant 0 : index
    %c0_3 = arith.constant 0 : index
    %4 = vector.load %arg2[%c0_2, %c0_3] : memref<16x32xf32, #tpu.memory_space<vmem>>, vector<16x32xf32>
    %c0_4 = arith.constant 0 : index
    %c0_5 = arith.constant 0 : index
    %5 = vector.load %arg3[%c0_4, %c0_5] : memref<16x32xf32, #tpu.memory_space<vmem>>, vector<16x32xf32>
    %6 = math.exp %4 : vector<16x32xf32>
    %7 = arith.mulf %6, %5 : vector<16x32xf32>
    %8 = arith.addf %3, %7 : vector<16x32xf32>
    %c0_6 = arith.constant 0 : index
    %c0_7 = arith.constant 0 : index
    %9 = vector.load %arg7[%c0_6, %c0_7] : memref<16x32xf32, #tpu.memory_space<vmem>>, vector<16x32xf32>
    tpu.vector_store %arg7[%c0_6, %c0_7], %8 {strides = array<i32>} : memref<16x32xf32, #tpu.memory_space<vmem>>, vector<16x32xf32>,
    %c0_8 = arith.constant 0 : index
    %c0_9 = arith.constant 0 : index
    %10 = memref.load %arg9[%c0_8, %c0_9] : memref<1x1xf32, #tpu.memory_space<smem>>
    %11 = arith.mulf %8, %8 : vector<16x32xf32>
    %12 = vector.shape_cast %11 : vector<16x32xf32> to vector<1x16x32xf32>
    %cst = arith.constant dense<0.000000e+00> : vector<1xf32>
    %13 = vector.multi_reduction <add>, %12, %cst [1, 2] : vector<1x16x32xf32> to vector<1xf32>
    %14 = vector.shape_cast %13 : vector<1xf32> to vector<1x1x1xf32>
    %15 = vector.extract %14[0, 0, 0] : f32 from vector<1x1x1xf32>
    %cst_10 = arith.constant -5.000000e-01 : f32
    %16 = arith.mulf %cst_10, %15 : f32
    %17 = arith.addf %10, %16 : f32
    %c0_11 = arith.constant 0 : index
    %c0_12 = arith.constant 0 : index
    %18 = memref.load %arg9[%c0_11, %c0_12] : memref<1x1xf32, #tpu.memory_space<smem>>
    memref.store %17, %arg9[%c0_11, %c0_12] : memref<1x1xf32, #tpu.memory_space<smem>>
    %c0_13 = arith.constant 0 : index
    %c0_14 = arith.constant 0 : index
    %19 = memref.load %arg10[%c0_13, %c0_14] : memref<1x1xf32, #tpu.memory_space<smem>>
    %20 = arith.mulf %5, %5 : vector<16x32xf32>
    %21 = vector.shape_cast %20 : vector<16x32xf32> to vector<1x16x32xf32>
    %cst_15 = arith.constant dense<0.000000e+00> : vector<1xf32>
    %22 = vector.multi_reduction <add>, %21, %cst_15 [1, 2] : vector<1x16x32xf32> to vector<1xf32>
    %23 = vector.shape_cast %22 : vector<1xf32> to vector<1x1x1xf32>
    %24 = vector.extract %23[0, 0, 0] : f32 from vector<1x1x1xf32>
    %cst_16 = arith.constant -5.000000e-01 : f32
    %25 = arith.mulf %cst_16, %24 : f32
    %26 = vector.shape_cast %4 : vector<16x32xf32> to vector<1x16x32xf32>
    %cst_17 = arith.constant dense<0.000000e+00> : vector<1xf32>
    %27 = vector.multi_reduction <add>, %26, %cst_17 [1, 2] : vector<1x16x32xf32> to vector<1xf32>
    %28 = vector.shape_cast %27 : vector<1xf32> to vector<1x1x1xf32>
    %29 = vector.extract %28[0, 0, 0] : f32 from vector<1x1x1xf32>
    %30 = arith.subf %25, %29 : f32
    %31 = arith.addf %19, %30 : f32
    %c0_18 = arith.constant 0 : index
    %c0_19 = arith.constant 0 : index
    %32 = memref.load %arg10[%c0_18, %c0_19] : memref<1x1xf32, #tpu.memory_space<smem>>
    memref.store %31, %arg10[%c0_18, %c0_19] : memref<1x1xf32, #tpu.memory_space<smem>>
    %c0_i32_20 = arith.constant 0 : i32
    %33 = arith.cmpi eq, %arg0, %c0_i32_20 : i32
    %34 = arith.extui %33 : i1 to i32
    %c0_i32_21 = arith.constant 0 : i32
    %35 = arith.cmpi ne, %34, %c0_i32_21 : i32
    scf.if %35 {
      %c0_22 = arith.constant 0 : index
      %c0_23 = arith.constant 0 : index
      %36 = vector.load %arg4[%c0_22, %c0_23] : memref<1x16xf32, #tpu.memory_space<vmem>>, vector<1x16xf32>
      %c0_24 = arith.constant 0 : index
      %c0_25 = arith.constant 0 : index
      %37 = vector.load %arg5[%c0_24, %c0_25] : memref<1x16xf32, #tpu.memory_space<vmem>>, vector<1x16xf32>
      %c0_26 = arith.constant 0 : index
      %c0_27 = arith.constant 0 : index
      %38 = vector.load %arg6[%c0_26, %c0_27] : memref<1x16xf32, #tpu.memory_space<vmem>>, vector<1x16xf32>
      %39 = math.exp %37 : vector<1x16xf32>
      %40 = arith.mulf %39, %38 : vector<1x16xf32>
      %41 = arith.addf %36, %40 : vector<1x16xf32>
      %c0_28 = arith.constant 0 : index
      %c0_29 = arith.constant 0 : index
      %42 = vector.load %arg8[%c0_28, %c0_29] : memref<1x16xf32, #tpu.memory_space<vmem>>, vector<1x16xf32>
      tpu.vector_store %arg8[%c0_28, %c0_29], %41 {strides = array<i32>} : memref<1x16xf32, #tpu.memory_space<vmem>>, vector<1x16xf32>,
      %c0_30 = arith.constant 0 : index
      %c0_31 = arith.constant 0 : index
      %43 = memref.load %arg9[%c0_30, %c0_31] : memref<1x1xf32, #tpu.memory_space<smem>>
      %44 = arith.mulf %41, %41 : vector<1x16xf32>
      %45 = vector.shape_cast %44 : vector<1x16xf32> to vector<1x1x16xf32>
      %cst_32 = arith.constant dense<0.000000e+00> : vector<1xf32>
      %46 = vector.multi_reduction <add>, %45, %cst_32 [1, 2] : vector<1x1x16xf32> to vector<1xf32>
      %47 = vector.shape_cast %46 : vector<1xf32> to vector<1x1x1xf32>
      %48 = vector.extract %47[0, 0, 0] : f32 from vector<1x1x1xf32>
      %cst_33 = arith.constant -5.000000e-01 : f32
      %49 = arith.mulf %cst_33, %48 : f32
      %50 = arith.addf %43, %49 : f32
      %c0_34 = arith.constant 0 : index
      %c0_35 = arith.constant 0 : index
      %51 = memref.load %arg9[%c0_34, %c0_35] : memref<1x1xf32, #tpu.memory_space<smem>>
      memref.store %50, %arg9[%c0_34, %c0_35] : memref<1x1xf32, #tpu.memory_space<smem>>
      %c0_36 = arith.constant 0 : index
      %c0_37 = arith.constant 0 : index
      %52 = memref.load %arg10[%c0_36, %c0_37] : memref<1x1xf32, #tpu.memory_space<smem>>
      %53 = arith.mulf %38, %38 : vector<1x16xf32>
      %54 = vector.shape_cast %53 : vector<1x16xf32> to vector<1x1x16xf32>
      %cst_38 = arith.constant dense<0.000000e+00> : vector<1xf32>
      %55 = vector.multi_reduction <add>, %54, %cst_38 [1, 2] : vector<1x1x16xf32> to vector<1xf32>
      %56 = vector.shape_cast %55 : vector<1xf32> to vector<1x1x1xf32>
      %57 = vector.extract %56[0, 0, 0] : f32 from vector<1x1x1xf32>
      %cst_39 = arith.constant -5.000000e-01 : f32
      %58 = arith.mulf %cst_39, %57 : f32
      %59 = vector.shape_cast %37 : vector<1x16xf32> to vector<1x1x16xf32>
      %cst_40 = arith.constant dense<0.000000e+00> : vector<1xf32>
      %60 = vector.multi_reduction <add>, %59, %cst_40 [1, 2] : vector<1x1x16xf32> to vector<1xf32>
      %61 = vector.shape_cast %60 : vector<1xf32> to vector<1x1x1xf32>
      %62 = vector.extract %61[0, 0, 0] : f32 from vector<1x1x1xf32>
      %63 = arith.subf %58, %62 : f32
      %64 = arith.addf %52, %63 : f32
      %c0_41 = arith.constant 0 : index
      %c0_42 = arith.constant 0 : index
      %65 = memref.load %arg10[%c0_41, %c0_42] : memref<1x1xf32, #tpu.memory_space<smem>>
      memref.store %64, %arg10[%c0_41, %c0_42] : memref<1x1xf32, #tpu.memory_space<smem>>
    } else {
    }
    return
  }
  func.func @transform_0(%arg0: i32) -> (i32, i32) {
    %c0_i32 = arith.constant 0 : i32
    %c0_i32_0 = arith.constant 0 : i32
    return %arg0, %c0_i32 : i32, i32
  }
  func.func @transform_1(%arg0: i32) -> (i32, i32) {
    %c0_i32 = arith.constant 0 : i32
    %c0_i32_0 = arith.constant 0 : i32
    return %arg0, %c0_i32 : i32, i32
  }
  func.func @transform_2(%arg0: i32) -> (i32, i32) {
    %c0_i32 = arith.constant 0 : i32
    %c0_i32_0 = arith.constant 0 : i32
    return %arg0, %c0_i32 : i32, i32
  }
  func.func @transform_3(%arg0: i32) -> (i32, i32) {
    %c0_i32 = arith.constant 0 : i32
    %c0_i32_0 = arith.constant 0 : i32
    %c0_i32_1 = arith.constant 0 : i32
    return %c0_i32, %c0_i32_0 : i32, i32
  }
  func.func @transform_4(%arg0: i32) -> (i32, i32) {
    %c0_i32 = arith.constant 0 : i32
    %c0_i32_0 = arith.constant 0 : i32
    %c0_i32_1 = arith.constant 0 : i32
    return %c0_i32, %c0_i32_0 : i32, i32
  }
  func.func @transform_5(%arg0: i32) -> (i32, i32) {
    %c0_i32 = arith.constant 0 : i32
    %c0_i32_0 = arith.constant 0 : i32
    %c0_i32_1 = arith.constant 0 : i32
    return %c0_i32, %c0_i32_0 : i32, i32
  }
  func.func @transform_6(%arg0: i32) -> (i32, i32) {
    %c0_i32 = arith.constant 0 : i32
    %c0_i32_0 = arith.constant 0 : i32
    return %arg0, %c0_i32 : i32, i32
  }
  func.func @transform_7(%arg0: i32) -> (i32, i32) {
    %c0_i32 = arith.constant 0 : i32
    %c0_i32_0 = arith.constant 0 : i32
    %c0_i32_1 = arith.constant 0 : i32
    return %c0_i32, %c0_i32_0 : i32, i32
  }
  func.func @transform_8(%arg0: i32) -> (i32, i32) {
    %c0_i32 = arith.constant 0 : i32
    %c0_i32_0 = arith.constant 0 : i32
    %c0_i32_1 = arith.constant 0 : i32
    return %c0_i32, %c0_i32_0 : i32, i32
  }
  func.func @transform_9(%arg0: i32) -> (i32, i32) {
    %c0_i32 = arith.constant 0 : i32
    %c0_i32_0 = arith.constant 0 : i32
    %c0_i32_1 = arith.constant 0 : i32
    return %c0_i32, %c0_i32_0 : i32, i32
  }
}

</mosaic_0001>

<bundles_post_ra>
// kernel: tpu_custom_call.1
= control target key start
LH: loop header
LB: loop body
LE: loop exit
PB: predicated region body
PF: predicated region fallthrough
CT: control target
= control target key end

     0   :  { %15 = vsyncpa [#allocation3], 0  ;;  %s523_s0 = inlined_call_operand.hbm [shape: f32[16,32], index: 0, kind: input, shape index: {}]   ;;  %s524_s1 = inlined_call_operand.hbm [shape: f32[16,32], index: 1, kind: input, shape index: {}]   ;;  %s525_s2 = inlined_call_operand.hbm [shape: f32[16,32], index: 2, kind: input, shape index: {}]   ;;  %s526_s3 = inlined_call_operand.vmem [shape: f32[1,16], index: 3, kind: input, shape index: {}]   ;;  %s527_s4 = inlined_call_operand.vmem [shape: f32[1,16], index: 4, kind: input, shape index: {}]   ;;  %s528_s5 = inlined_call_operand.vmem [shape: f32[1,16], index: 5, kind: input, shape index: {}]   ;;  %s529_s6 = inlined_call_operand.hbm [shape: f32[16,32], index: 6, kind: output, shape index: {0}]   ;;  %s530_s7 = inlined_call_operand.hbm [shape: f32[1,16], index: 7, kind: output, shape index: {1}]   ;;  %s531_s8 = inlined_call_operand.hbm [shape: f32[1,1], index: 8, kind: output, shape index: {2}]   ;;  %s532_s9 = inlined_call_operand.hbm [shape: f32[1,1], index: 9, kind: output, shape index: {3}]  }
   0x1   :  { %16 = vsyncpa [#allocation7], 0 }
   0x2   :  { %17 = vsyncpa [#allocation4], 0 }
   0x3   :  { %18 = vsyncpa [#allocation11], 0 }
   0x4   :  { %19 = vsyncpa [#allocation5], 0 }
   0x5   :  { %20 = vsyncpa [#allocation14], 0  ;;  %s414_s30 = smov [#allocation6]   ;;  %s415_s11 = smov [#allocation2]  }
   0x6   :  { %s38_s10 = sshll.u32 %s414_s30, 4  ;;  %s26_s12 = sshll.u32 %s415_s11, 4  ;;  %s39_s10 = int_to_ptr.vmem [resolvable:$true] %s38_s10  ;;  %s27_s12 = int_to_ptr.vmem [resolvable:$true] %s26_s12 }
   0x7   :  { %s294_s13 = scalar_lea.vmem %s39_s10, 256  ;;  %p299_p1 = scmp.lt.s32.totalorder %s39_s10, %s39_s10 }
   0x8   :  { %p295_p0 = scmp.ne.s32.totalorder %s39_s10, %s294_s13  ;;  %p300_p2 = scmp.lt.s32.totalorder %s294_s13, %s294_s13 }
   0xa   :  { %p301_p3 = por %p300_p2, %p299_p1 }
   0xc   :  { %p302_p4 = pnand %p301_p3, %p295_p0 }
   0xe   :  { %305 = shalt.err (!%p302_p4)
}
   0xf   :  { %s416_s14 = smov 128   ;;  %s417_s15 = smov 8  }
  0x10   :  { %44 = dma.hbm_to_vmem [thread:$0]  %s524_s1, 256, %s39_s10, [#allocation7], %s416_s14, %s416_s14, %s417_s15  }
  0x11   :  { %s314_s18 = scalar_lea.vmem %s27_s12, 256  ;;  %p319_p6 = scmp.lt.s32.totalorder %s27_s12, %s27_s12 }
  0x12   :  { %p315_p5 = scmp.ne.s32.totalorder %s27_s12, %s314_s18  ;;  %p320_p7 = scmp.lt.s32.totalorder %s314_s18, %s314_s18 }
  0x14   :  { %p321_p8 = por %p320_p7, %p319_p6 }
  0x16   :  { %p322_p9 = pnand %p321_p8, %p315_p5 }
  0x18   :  { %325 = shalt.err (!%p322_p9)
}
  0x19   :  { %32 = dma.hbm_to_vmem [thread:$0]  %s523_s0, 256, %s27_s12, [#allocation3], %s416_s14, %s416_s14, %s417_s15  }
  0x1a   :  { %s418_s21 = smov [#allocation8]  }
  0x1b   :  { %s50_s22 = sshll.u32 %s418_s21, 4  ;;  %s51_s22 = int_to_ptr.vmem [resolvable:$true] %s50_s22 }
  0x1c   :  { %s334_s23 = scalar_lea.vmem %s51_s22, 256  ;;  %p339_p11 = scmp.lt.s32.totalorder %s51_s22, %s51_s22 }
  0x1d   :  { %p335_p10 = scmp.ne.s32.totalorder %s51_s22, %s334_s23  ;;  %p340_p12 = scmp.lt.s32.totalorder %s334_s23, %s334_s23 }
  0x1f   :  { %p341_p13 = por %p340_p12, %p339_p11 }
  0x21   :  { %p342_p0 = pnand %p341_p13, %p335_p10 }
  0x23   :  { %345 = shalt.err (!%p342_p0)
}
  0x24   :  { %56 = dma.hbm_to_vmem [thread:$0]  %s525_s2, 256, %s51_s22, [#allocation7], %s416_s14, %s416_s14, %s417_s15  }
  0x25   :  { %402 = dma.done.wait [#allocation3], 256  }
  0x26   :  { %403 = vsyncadd [#allocation3], 4294967040 }
  0x27   :  { %404 = dma.done.wait [#allocation7], 512  }
  0x28   :  { %405 = vsyncadd [#allocation7], 4294966784  ;;  %vm94_vm0 = vcmask 261120   ;;  %v82_v0 = vld [vmem:[#allocation6] sm:$0xff]  ;;  %v83_v1 = vld [vmem:[#allocation6 + $0x8] sm:$0xff]  ;;  %vm158_vm1 = vcmask 122880  }
  0x29   :  { %v88_v2 = vmul.f32 1.442695, %v83_v1  ;;  %v132_v3 = vsel %vm94_vm0, %v82_v0, 0.0  ;;  %v133_v4 = vsel %vm94_vm0, %v83_v1, 0.0  ;;  %v86_v5 = vmul.f32 1.442695, %v82_v0 }
  0x2a   :  { %v134_v6 = vadd.f32 %v133_v4, %v132_v3  ;;  %v152_v7 = vld [vmem:[%s527_s4] sm:$0x1]  ;;  %v85_v9 = vld [vmem:[#allocation8 + $0x8] sm:$0xff]  ;;  %s420_s28 = smov [#allocation10]  }
  0x2b   :  { %280 = vpow2.f32 %v88_v2  ;;  %v154_v8 = vmul.f32 1.442695, %v152_v7  ;;  %v84_v10 = vld [vmem:[#allocation8] sm:$0xff]  ;;  %v81_v12 = vld [vmem:[#allocation2 + $0x8] sm:$0xff]  ;;  %v118_v23 = vmul.f32 %v85_v9, %v85_v9  ;;  %v188_v37 = vsel %vm158_vm1, %v152_v7, 0.0  ;;  %s219_s29 = sshll.u32 %s420_s28, 4  ;;  %s220_s29 = int_to_ptr.vmem [resolvable:$true] %s219_s29 }
  0x2c   :  { %135 = vadd.xlane.f32.xlu1 %v134_v6  ;;  %282 = vpow2.f32 %v86_v5  ;;  %v80_v14 = vld [vmem:[#allocation2] sm:$0xff]  ;;  %v117_v22 = vmul.f32 %v84_v10, %v84_v10 }
  0x2d   :  { %284 = vpow2.f32 %v154_v8  ;;  %v153_v16 = vld [vmem:[%s528_s5] sm:$0x1]  ;;  %v120_v31 = vsel %vm94_vm0, %v118_v23, 0.0 }
  0x2e   :  { %v151_v20 = vld [vmem:[%s526_s3] sm:$0x1]  ;;  %v119_v30 = vsel %vm94_vm0, %v117_v22, 0.0  ;;  %v176_v36 = vmul.f32 %v153_v16, %v153_v16  ;;  %s419_s3 = smov [#allocation9]  }
  0x2f   :  { %v121_v35 = vadd.f32 %v120_v31, %v119_v30  ;;  %s206_s5 = sshll.u32 %s419_s3, 4  ;;  %s207_s5 = int_to_ptr.vmem [resolvable:$true] %s206_s5 }
  0x30   :  { %v177_v38 = vsel %vm158_vm1, %v176_v36, 0.0  ;;  %s346_s30 = scalar_lea.vmem %s207_s5, 256  ;;  %p351_p2 = scmp.lt.s32.totalorder %s207_s5, %s207_s5 }
  0x31   :  { %p347_p1 = scmp.ne.s32.totalorder %s207_s5, %s346_s30  ;;  %p352_p3 = scmp.lt.s32.totalorder %s346_s30, %s346_s30 }
  0x33   :  { %p353_p4 = por %p352_p3, %p351_p2 }
  0x35   :  { %p354_p5 = pnand %p353_p4, %p347_p1 }
  0x38   :  { %v281_v11 = vpop.eup %280 }
  0x39   :  { %v283_v13 = vpop.eup %282  ;;  %v91_v15 = vmul.f32 %v281_v11, %v85_v9 }
  0x3a   :  { %v90_v17 = vmul.f32 %v283_v13, %v84_v10  ;;  %v285_v18 = vpop.eup %284 }
  0x3b   :  { %v93_v19 = vadd.f32 %v91_v15, %v81_v12  ;;  %v156_v24 = vmul.f32 %v285_v18, %v153_v16 }
  0x3c   :  { %v92_v21 = vadd.f32 %v90_v17, %v80_v14 }
  0x3d   :  { %v99_v25 = vmul.f32 %v93_v19, %v93_v19  ;;  %96 = vst.msk [vmem:[#allocation9 + $0x8] sm:$0xff] %vm94_vm0, %v93_v19  ;;  %v157_v27 = vadd.f32 %v156_v24, %v151_v20 }
  0x3e   :  { %v98_v26 = vmul.f32 %v92_v21, %v92_v21  ;;  %95 = vst.msk [vmem:[#allocation9] sm:$0xff] %vm94_vm0, %v92_v21 }
  0x3f   :  { %v101_v28 = vsel %vm94_vm0, %v99_v25, 0.0  ;;  %v161_v32 = vmul.f32 %v157_v27, %v157_v27  ;;  %159 = vst.msk [vmem:[#allocation10] sm:$0x1] %vm158_vm1, %v157_v27 }
  0x40   :  { %v100_v29 = vsel %vm94_vm0, %v98_v26, 0.0 }
  0x41   :  { %v102_v33 = vadd.f32 %v101_v28, %v100_v29  ;;  %v162_v34 = vsel %vm158_vm1, %v161_v32, 0.0 }
  0x42   :  { %163 = vadd.xlane.f32.xlu1 %v162_v34 }
  0x43   :  { %103 = vadd.xlane.f32.xlu0 %v102_v33 }
  0x46   :  { %189 = vadd.xlane.f32.xlu1 %v188_v37 }
  0x47   :  { %122 = vadd.xlane.f32.xlu0 %v121_v35 }
  0x4b   :  { %178 = vadd.xlane.f32.xlu0 %v177_v38 }
  0x4c   :  { %357 = shalt.err (!%p354_p5)
}
  0x4d   :  { %212 = dma.vmem_to_hbm [thread:$0]  %s207_s5, 256, %s529_s6, [#allocation4], %s416_s14, %s416_s14, %s417_s15  }
  0x4e   :  { %s366_s12 = scalar_lea.vmem %s220_s29, 16  ;;  %s370_s13 = scalar_lea.vmem %s220_s29, 32 }
  0x4f   :  { %p367_p6 = scmp.ne.s32.totalorder %s220_s29, %s366_s12  ;;  %p371_p7 = scmp.lt.s32.totalorder %s220_s29, %s220_s29 }
  0x50   :  { %p372_p8 = scmp.lt.s32.totalorder %s370_s13, %s366_s12 }
  0x52   :  { %p373_p9 = por %p372_p8, %p371_p7 }
  0x54   :  { %p374_p10 = pnand %p373_p9, %p367_p6 }
  0x56   :  { %377 = shalt.err (!%p374_p10)
}
  0x57   :  { %222 = dma.vmem_to_hbm [thread:$0]  %s220_s29, 16, %s530_s7, [#allocation11]  }
  0x58   :  { %s421_s27 = smov [#allocation12]   ;;  %s422_s5 = smov [#allocation13]  }
  0xb5   :  { %v136_v39 = vpop.xlane.xlu1 %135 }
  0xb6   :  { %v137_v40 = vrot.slane %v136_v39, 4 }
  0xb8   :  { %v138_v41 = vadd.f32 %v137_v40, %v136_v39 }
  0xba   :  { %v139_v48 = vrot.slane %v138_v41, 2 }
  0xbc   :  { %v140_v59 = vadd.f32 %v139_v48, %v138_v41 }
  0xbe   :  { %v141_v5 = vrot.slane %v140_v59, 1 }
  0xc0   :  { %v142_v11 = vadd.f32 %v141_v5, %v140_v59 }
  0xcb   :  { %v164_v43 = vpop.xlane.xlu1 %163 }
  0xcc   :  { %v104_v42 = vpop.xlane.xlu0 %103  ;;  %v165_v45 = vrot.slane %v164_v43, 4 }
  0xcd   :  { %v105_v44 = vrot.slane %v104_v42, 4 }
  0xce   :  { %v166_v47 = vadd.f32 %v165_v45, %v164_v43 }
  0xcf   :  { %v106_v46 = vadd.f32 %v105_v44, %v104_v42  ;;  %v190_v50 = vpop.xlane.xlu1 %189 }
  0xd0   :  { %v123_v49 = vpop.xlane.xlu0 %122  ;;  %v167_v53 = vrot.slane %v166_v47, 2  ;;  %v191_v54 = vrot.slane %v190_v50, 4 }
  0xd1   :  { %v107_v51 = vrot.slane %v106_v46, 2  ;;  %v124_v52 = vrot.slane %v123_v49, 4 }
  0xd2   :  { %v192_v56 = vadd.f32 %v191_v54, %v190_v50  ;;  %v168_v60 = vadd.f32 %v167_v53, %v166_v47 }
  0xd3   :  { %v125_v55 = vadd.f32 %v124_v52, %v123_v49  ;;  %v108_v57 = vadd.f32 %v107_v51, %v106_v46 }
  0xd4   :  { %v179_v58 = vpop.xlane.xlu0 %178  ;;  %v193_v63 = vrot.slane %v192_v56, 2  ;;  %v169_v8 = vrot.slane %v168_v60, 1 }
  0xd5   :  { %v126_v61 = vrot.slane %v125_v55, 2  ;;  %v180_v62 = vrot.slane %v179_v58, 4  ;;  %v109_v0 = vrot.slane %v108_v57, 1 }
  0xd6   :  { %v194_v4 = vadd.f32 %v193_v63, %v192_v56  ;;  %v170_v13 = vadd.f32 %v169_v8, %v168_v60 }
  0xd7   :  { %v181_v1 = vadd.f32 %v180_v62, %v179_v58  ;;  %v110_v2 = vadd.f32 %v109_v0, %v108_v57  ;;  %v127_v3 = vadd.f32 %v126_v61, %v125_v55 }
  0xd8   :  { %v195_v12 = vrot.slane %v194_v4, 1 }
  0xd9   :  { %v182_v6 = vrot.slane %v181_v1, 2  ;;  %258 = vpush %v110_v2  ;;  %v128_v7 = vrot.slane %v127_v3, 1 }
  0xda   :  { %v196_v16 = vadd.f32 %v195_v12, %v194_v4 }
  0xdb   :  { %v183_v9 = vadd.f32 %v182_v6, %v181_v1  ;;  %v129_v10 = vadd.f32 %v128_v7, %v127_v3 }
  0xdd   :  { %260 = vpush %v129_v10  ;;  %v184_v14 = vrot.slane %v183_v9, 1 }
  0xde   :  { %262 = vpush %v142_v11 }
  0xdf   :  { %264 = vpush %v170_v13  ;;  %v185_v15 = vadd.f32 %v184_v14, %v183_v9 }
  0xe1   :  { %266 = vpush %v185_v15 }
  0xe2   :  { %268 = vpush %v196_v16 }
 0x10a   :  { %s259_s6 = spop %258 }
 0x10b   :  { %s112_s7 = smul.f32 -0.5, %s259_s6 }
 0x10d   :  { %s113_s22 = sadd.f32 -485.19955, %s112_s7 }
 0x10e   :  { %s261_s14 = spop %260 }
 0x10f   :  { %s131_s15 = smul.f32 -0.5, %s261_s14  ;;  %s263_s18 = spop %262 }
 0x110   :  { %s265_s19 = spop %264 }
 0x111   :  { %s144_s20 = ssub.f32 %s131_s15, %s263_s18  ;;  %s172_s21 = smul.f32 -0.5, %s265_s19 }
 0x112   :  { %s267_s23 = spop %266 }
 0x113   :  { %s145_s1 = sadd.f32 -485.19955, %s144_s20  ;;  %s187_s24 = smul.f32 -0.5, %s267_s23 }
 0x114   :  { %s173_s0 = sadd.f32 %s172_s21, %s113_s22  ;;  %s269_s25 = spop %268 }
 0x115   :  { %s198_s2 = ssub.f32 %s187_s24, %s269_s25 }
 0x116   :  { %174 = sst [smem:[#allocation12]] %s173_s0 }
 0x117   :  { %s199_s26 = sadd.f32 %s198_s2, %s145_s1 }
 0x118   :  { %230 = dma.smem_to_hbm %s421_s27, 16, %s531_s8, [#allocation5]  }
 0x119   :  { %200 = sst [smem:[#allocation13]] %s199_s26 }
 0x11a   :  { %238 = dma.smem_to_hbm %s422_s5, 16, %s532_s9, [#allocation14]  }
 0x11b   :  { %406 = dma.done.wait [#allocation4], 256  }
 0x11c   :  { %407 = vsyncadd [#allocation4], 4294967040 }
 0x11d   :  { %408 = dma.done.wait [#allocation11], 16  }
 0x11e   :  { %409 = vsyncadd [#allocation11], 4294967280 }
 0x11f   :  { %410 = dma.done.wait [#allocation5], 16  }
 0x120   :  { %411 = vsyncadd [#allocation5], 4294967280 }
 0x121   :  { %412 = dma.done.wait [#allocation14], 16  }
 0x122   :  { %413 = vsyncadd [#allocation14], 4294967280 }
 0x123   :  { %251 = sfence }
 0x124   :  { %252 = vsyncpa [#allocation3], 1 }
 0x125   :  { %253 = vsyncpa [#allocation7], 1 }
 0x126   :  { %254 = vsyncpa [#allocation4], 1 }
 0x127   :  { %255 = vsyncpa [#allocation11], 1 }
 0x128   :  { %256 = vsyncpa [#allocation5], 1 }
 0x129   :  { %257 = vsyncpa [#allocation14], 1 }

</bundles_post_ra>
